<compile_context>
chip_gen: v5e
topology: v5e:2x2
jax: 0.10.0
libtpu: 0.0.40
codegen_flags: <defaults>
</compile_context>

<pallas_src>
import jax
import jax.numpy as jnp
from jax.experimental import pallas as pl
from jax.experimental.pallas import tpu as pltpu


def _round_up(x, m):
    return (x + m - 1) // m * m


def _mlp_kernel(x_ref, wg_ref, wu_ref, wd_ref, o_ref, acc_ref):
    # x_ref:  (tm, H)   tile of tokens
    # wg_ref: (H, ti)   gate_proj weight tile (transposed vs torch)
    # wu_ref: (H, ti)   up_proj weight tile
    # wd_ref: (ti, H)   down_proj weight tile
    # o_ref:  (tm, H)   output tile (resident across the k axis)
    # acc_ref:(tm, H)   f32 accumulator scratch
    k = pl.program_id(1)

    @pl.when(k == 0)
    def _():
        acc_ref[...] = jnp.zeros_like(acc_ref)

    x = x_ref[...]
    gate = jnp.dot(x, wg_ref[...], preferred_element_type=jnp.float32)
    up = jnp.dot(x, wu_ref[...], preferred_element_type=jnp.float32)
    # SiLU(gate) * up  (hidden_act = "silu" for Qwen2), computed in f32.
    h = (gate * jax.nn.sigmoid(gate)) * up
    acc_ref[...] += jnp.dot(
        h.astype(x.dtype), wd_ref[...], preferred_element_type=jnp.float32
    )

    @pl.when(k == pl.num_programs(1) - 1)
    def _():
        o_ref[...] = acc_ref[...].astype(o_ref.dtype)


def qwen2_mlp(x, w_gate, w_up, w_down, *, tm=256, ti=512,
              vmem_limit_bytes=48 * 1024 * 1024):
    """x: [B, S, H]; weights already in [in, out] layout."""
    B, S, H = x.shape
    Hw, I = w_gate.shape
    assert Hw == H and w_up.shape == (H, I) and w_down.shape == (I, H)

    M = B * S
    x2 = x.reshape(M, H)

    # Sublane packing: 8 rows for 4-byte, 16 for 2-byte, 32 for 1-byte dtypes.
    itemsize = jnp.dtype(x.dtype).itemsize
    sub = max(8, 32 // itemsize)

    # Effective tile sizes: respect (sublane, 128-lane) layout, clamp to problem.
    tm_eff = min(_round_up(tm, sub), _round_up(M, sub))
    ti_eff = min(_round_up(ti, 128), _round_up(I, 128))

    Mp = _round_up(M, tm_eff)
    Ip = _round_up(I, ti_eff)

    if Mp != M:
        x2 = jnp.pad(x2, ((0, Mp - M), (0, 0)))
    if Ip != I:
        # Zero-padded intermediate units contribute exactly zero:
        # silu(0) * up = 0, and zero rows of w_down add nothing.
        w_gate = jnp.pad(w_gate, ((0, 0), (0, Ip - I)))
        w_up = jnp.pad(w_up, ((0, 0), (0, Ip - I)))
        w_down = jnp.pad(w_down, ((0, Ip - I), (0, 0)))

    m_tiles = Mp // tm_eff
    k_tiles = Ip // ti_eff

    cost = pl.CostEstimate(
        flops=6 * M * H * I,
        transcendentals=M * I,
        bytes_accessed=(2 * M * H + 3 * H * I) * itemsize,
    )

    out = pl.pallas_call(
        _mlp_kernel,
        out_shape=jax.ShapeDtypeStruct((Mp, H), x.dtype),
        grid_spec=pltpu.PrefetchScalarGridSpec(
            num_scalar_prefetch=0,
            grid=(m_tiles, k_tiles),
            in_specs=[
                pl.BlockSpec((tm_eff, H), lambda i, k: (i, 0)),   # x tile
                pl.BlockSpec((H, ti_eff), lambda i, k: (0, k)),   # gate_proj tile
                pl.BlockSpec((H, ti_eff), lambda i, k: (0, k)),   # up_proj tile
                pl.BlockSpec((ti_eff, H), lambda i, k: (k, 0)),   # down_proj tile
            ],
            out_specs=pl.BlockSpec((tm_eff, H), lambda i, k: (i, 0)),
            scratch_shapes=[pltpu.VMEM((tm_eff, H), jnp.float32)],
        ),
        compiler_params=pltpu.CompilerParams(
            dimension_semantics=("parallel", "arbitrary"),
            vmem_limit_bytes=vmem_limit_bytes,
        ),
        cost_estimate=cost,
    )(x2, w_gate, w_up, w_down)

    if Mp != M:
        out = out[:M]
    return out.reshape(B, S, H)


def qwen2_mlp_ref(x, w_gate, w_up, w_down):
    gate = jnp.einsum("bsh,hi->bsi", x, w_gate)
    up = jnp.einsum("bsh,hi->bsi", x, w_up)
    h = jax.nn.silu(gate) * up
    return jnp.einsum("bsi,ih->bsh", h, w_down)


if __name__ == "__main__":
    # Small, TPU-friendly config. seq=9 -> M=18 exercises the M-padding path;
    # ti=128 with intermediate=384 exercises the k-axis accumulation (3 steps).
    batch, seq = 2, 9
    hidden_size = 128
    intermediate_size = 384

    key = jax.random.PRNGKey(0)
    kx, kg, ku, kd = jax.random.split(key, 4)

    x = jax.random.normal(kx, (batch, seq, hidden_size), dtype=jnp.float32)
    scale = 0.02
    w_gate = scale * jax.random.normal(kg, (hidden_size, intermediate_size), jnp.float32)
    w_up = scale * jax.random.normal(ku, (hidden_size, intermediate_size), jnp.float32)
    w_down = scale * jax.random.normal(kd, (intermediate_size, hidden_size), jnp.float32)

    ref = qwen2_mlp_ref(x, w_gate, w_up, w_down)

    # f32 path.
    out = jax.block_until_ready(qwen2_mlp(x, w_gate, w_up, w_down, ti=128))
    assert out.shape == (batch, seq, hidden_size)
    assert jnp.allclose(out, ref, atol=1e-5, rtol=1e-5), "f32 mismatch vs reference"

    # bf16 path (recommended for real Qwen2 sizes); looser tolerance due to
    # bf16 rounding of inputs/weights and of the SiLU*up product.
    xb = x.astype(jnp.bfloat16)
    wgb = w_gate.astype(jnp.bfloat16)
    wub = w_up.astype(jnp.bfloat16)
    wdb = w_down.astype(jnp.bfloat16)
    out_bf16 = jax.block_until_ready(qwen2_mlp(xb, wgb, wub, wdb, ti=128))
    assert out_bf16.shape == (batch, seq, hidden_size)
    assert jnp.allclose(out_bf16.astype(jnp.float32), ref, atol=5e-2, rtol=5e-2), \
        "bf16 mismatch vs reference"

    print("KERNEL_OK")
</pallas_src>

<mosaic_0001>
module attributes {stable_mosaic.version = 11 : i64} {
  func.func @_mlp_kernel(%arg0: i32, %arg1: i32, %arg2: memref<24x128xf32, #tpu.memory_space<vmem>>, %arg3: memref<128x128xf32, #tpu.memory_space<vmem>>, %arg4: memref<128x128xf32, #tpu.memory_space<vmem>>, %arg5: memref<128x128xf32, #tpu.memory_space<vmem>>, %arg6: memref<24x128xf32, #tpu.memory_space<vmem>>, %arg7: memref<24x128xf32, #tpu.memory_space<vmem>>) attributes {dimension_semantics = [#tpu.dimension_semantics<parallel>, #tpu.dimension_semantics<arbitrary>], iteration_bounds = array<i64: 1, 3>, scalar_prefetch = 0 : i64, scratch_operands = 1 : i64, tpu.core_type = #tpu.core_type<tc>, window_params = [{transform_indices = @transform_0, window_bounds = array<i64: 24, 128>}, {transform_indices = @transform_1, window_bounds = array<i64: 128, 128>}, {transform_indices = @transform_2, window_bounds = array<i64: 128, 128>}, {transform_indices = @transform_3, window_bounds = array<i64: 128, 128>}, {transform_indices = @transform_4, window_bounds = array<i64: 24, 128>}]} {
    %c0_i32 = arith.constant 0 : i32
    %0 = arith.cmpi eq, %arg1, %c0_i32 : i32
    %1 = arith.extui %0 : i1 to i32
    %c0_i32_0 = arith.constant 0 : i32
    %2 = arith.cmpi ne, %1, %c0_i32_0 : i32
    scf.if %2 {
      %cst_16 = arith.constant 0.000000e+00 : f32
      %23 = vector.broadcast %cst_16 : f32 to vector<24x128xf32>
      %c0_17 = arith.constant 0 : index
      %c0_18 = arith.constant 0 : index
      %24 = vector.load %arg7[%c0_17, %c0_18] : memref<24x128xf32, #tpu.memory_space<vmem>>, vector<24x128xf32>
      tpu.vector_store %arg7[%c0_17, %c0_18], %23 {strides = array<i32>} : memref<24x128xf32, #tpu.memory_space<vmem>>, vector<24x128xf32>,
    } else {
    }
    %c0 = arith.constant 0 : index
    %c0_1 = arith.constant 0 : index
    %3 = vector.load %arg2[%c0, %c0_1] : memref<24x128xf32, #tpu.memory_space<vmem>>, vector<24x128xf32>
    %c0_2 = arith.constant 0 : index
    %c0_3 = arith.constant 0 : index
    %4 = vector.load %arg3[%c0_2, %c0_3] : memref<128x128xf32, #tpu.memory_space<vmem>>, vector<128x128xf32>
    %cst = arith.constant dense<0.000000e+00> : vector<24x128xf32>
    %5 = tpu.matmul %3, %4, %cst {dimension_numbers = #tpu.dot_dimension_numbers<[1], [0], [0], [1], [0, 0, 1, 1], [], []>} : vector<24x128xf32>, vector<128x128xf32>, vector<24x128xf32> -> vector<24x128xf32>
    %c0_4 = arith.constant 0 : index
    %c0_5 = arith.constant 0 : index
    %6 = vector.load %arg4[%c0_4, %c0_5] : memref<128x128xf32, #tpu.memory_space<vmem>>, vector<128x128xf32>
    %cst_6 = arith.constant dense<0.000000e+00> : vector<24x128xf32>
    %7 = tpu.matmul %3, %6, %cst_6 {dimension_numbers = #tpu.dot_dimension_numbers<[1], [0], [0], [1], [0, 0, 1, 1], [], []>} : vector<24x128xf32>, vector<128x128xf32>, vector<24x128xf32> -> vector<24x128xf32>
    %8 = arith.negf %5 : vector<24x128xf32>
    %9 = math.exp %8 : vector<24x128xf32>
    %cst_7 = arith.constant 1.000000e+00 : f32
    %10 = vector.broadcast %cst_7 : f32 to vector<24x128xf32>
    %11 = arith.addf %10, %9 : vector<24x128xf32>
    %12 = arith.divf %10, %11 : vector<24x128xf32>
    %13 = arith.mulf %5, %12 : vector<24x128xf32>
    %14 = arith.mulf %13, %7 : vector<24x128xf32>
    %c0_8 = arith.constant 0 : index
    %c0_9 = arith.constant 0 : index
    %15 = vector.load %arg7[%c0_8, %c0_9] : memref<24x128xf32, #tpu.memory_space<vmem>>, vector<24x128xf32>
    %c0_10 = arith.constant 0 : index
    %c0_11 = arith.constant 0 : index
    %16 = vector.load %arg5[%c0_10, %c0_11] : memref<128x128xf32, #tpu.memory_space<vmem>>, vector<128x128xf32>
    %cst_12 = arith.constant dense<0.000000e+00> : vector<24x128xf32>
    %17 = tpu.matmul %14, %16, %cst_12 {dimension_numbers = #tpu.dot_dimension_numbers<[1], [0], [0], [1], [0, 0, 1, 1], [], []>} : vector<24x128xf32>, vector<128x128xf32>, vector<24x128xf32> -> vector<24x128xf32>
    %18 = arith.addf %15, %17 : vector<24x128xf32>
    %c0_13 = arith.constant 0 : index
    %c0_14 = arith.constant 0 : index
    %19 = vector.load %arg7[%c0_13, %c0_14] : memref<24x128xf32, #tpu.memory_space<vmem>>, vector<24x128xf32>
    tpu.vector_store %arg7[%c0_13, %c0_14], %18 {strides = array<i32>} : memref<24x128xf32, #tpu.memory_space<vmem>>, vector<24x128xf32>,
    %c2_i32 = arith.constant 2 : i32
    %20 = arith.cmpi eq, %arg1, %c2_i32 : i32
    %21 = arith.extui %20 : i1 to i32
    %c0_i32_15 = arith.constant 0 : i32
    %22 = arith.cmpi ne, %21, %c0_i32_15 : i32
    scf.if %22 {
      %c0_16 = arith.constant 0 : index
      %c0_17 = arith.constant 0 : index
      %23 = vector.load %arg7[%c0_16, %c0_17] : memref<24x128xf32, #tpu.memory_space<vmem>>, vector<24x128xf32>
      %c0_18 = arith.constant 0 : index
      %c0_19 = arith.constant 0 : index
      %24 = vector.load %arg6[%c0_18, %c0_19] : memref<24x128xf32, #tpu.memory_space<vmem>>, vector<24x128xf32>
      tpu.vector_store %arg6[%c0_18, %c0_19], %23 {strides = array<i32>} : memref<24x128xf32, #tpu.memory_space<vmem>>, vector<24x128xf32>,
    } else {
    }
    return
  }
  func.func @transform_0(%arg0: i32, %arg1: i32) -> (i32, i32) {
    %c0_i32 = arith.constant 0 : i32
    %c0_i32_0 = arith.constant 0 : i32
    return %arg0, %c0_i32 : i32, i32
  }
  func.func @transform_1(%arg0: i32, %arg1: i32) -> (i32, i32) {
    %c0_i32 = arith.constant 0 : i32
    %c0_i32_0 = arith.constant 0 : i32
    return %c0_i32, %arg1 : i32, i32
  }
  func.func @transform_2(%arg0: i32, %arg1: i32) -> (i32, i32) {
    %c0_i32 = arith.constant 0 : i32
    %c0_i32_0 = arith.constant 0 : i32
    return %c0_i32, %arg1 : i32, i32
  }
  func.func @transform_3(%arg0: i32, %arg1: i32) -> (i32, i32) {
    %c0_i32 = arith.constant 0 : i32
    %c0_i32_0 = arith.constant 0 : i32
    return %arg1, %c0_i32 : i32, i32
  }
  func.func @transform_4(%arg0: i32, %arg1: i32) -> (i32, i32) {
    %c0_i32 = arith.constant 0 : i32
    %c0_i32_0 = arith.constant 0 : i32
    return %arg0, %c0_i32 : i32, i32
  }
}

</mosaic_0001>

<bundles_post_ra>
// kernel: tpu_custom_call.1
= control target key start
LH: loop header
LB: loop body
LE: loop exit
PB: predicated region body
PF: predicated region fallthrough
CT: control target
= control target key end

     0   :  { %s1278_s0 = inlined_call_operand.hbm [shape: f32[24,128], index: 0, kind: input, shape index: {}]   ;;  %s1279_s1 = inlined_call_operand.hbm [shape: f32[128,384], index: 1, kind: input, shape index: {}]   ;;  %s1280_s2 = inlined_call_operand.hbm [shape: f32[128,384], index: 2, kind: input, shape index: {}]   ;;  %s1281_s3 = inlined_call_operand.hbm [shape: f32[384,128], index: 3, kind: input, shape index: {}]   ;;  %s1282_s4 = inlined_call_operand.hbm [shape: f32[24,128], index: 4, kind: output, shape index: {}]  }
   0x1   :  { %1284 = sst [smem:[#allocation16_spill]] %s1278_s0 }
   0x2   :  { %1285 = sst [smem:[#allocation17_spill]] %s1279_s1 }
   0x3   :  { %1286 = sst [smem:[#allocation18_spill]] %s1280_s2 }
   0x4   :  { %9 = vsyncpa [#allocation4], 0 }
   0x5   :  { %10 = vsyncpa [#allocation7], 0 }
   0x6   :  { %12 = vsyncpa [#allocation7 + $0x1], 0 }
   0x7   :  { %13 = vsyncpa [#allocation10], 0 }
   0x8   :  { %15 = vsyncpa [#allocation10 + $0x1], 0 }
   0x9   :  { %16 = vsyncpa [#allocation5], 0  ;;  %s1068_s15 = smov 0   ;;  %s1070_s16 = smov 0  }
   0xa   :  { %s1072_s17 = smov 0   ;;  %s1074_s18 = smov 0  }
   0xb   :  { %s1076_s19 = smov 0   ;;  %s1078_s20 = smov 0  }
   0xc LB: > { %s31_s21 = sadd.s32 1, %s1029_s19  ;;  %s67_s22 = sadd.s32 1, %s1021_s17  ;;  %s1033_s20 = sphi %s1078_s20, %s22_s20   ;;  %s1029_s19 = sphi %s1076_s19, %s1299_s19   ;;  %s1025_s18 = sphi %s1074_s18, %s1298_s18   ;;  %s1021_s17 = sphi %s1072_s17, %s1297_s17   ;;  %s1017_s16 = sphi %s1070_s16, %s1296_s16   ;;  %s1013_s15 = sphi %s1068_s15, %s1295_s15  }
   0xd   : > { %p32_p0 = scmp.ge.s32.totalorder %s31_s21, 3  ;;  %p74_p1 = scmp.ne.s32.totalorder %s1021_s17, %s1017_s16 }
   0xe   : > { %p75_p2 = scmp.eq.s32.totalorder %s1033_s20, 0  ;;  %p751_p5 = scmp.lt.s32.totalorder %s1033_s20, 3 }
   0xf   : > { %s1301_s21 = smov (%p32_p0, %s31_s21), 0  ;;  %s199_s25 = sand.u32 1, %s1033_s20  }
  0x10   : > { %p1105_p3 = por %p75_p2, %p74_p1  ;;  %s64_s24 = ssub.s32 %s1029_s19, %s1301_s21 }
  0x11   : > { %p65_p4 = scmp.eq.s32.totalorder %s64_s24, 0  ;;  %s1283_s26 = sand.u32 1, %s1021_s17  }
  0x12   : > { %s1119_s28 = sshll.u32 %s1283_s26, 7  ;;  %s685_s29 = sshll.u32 %s1029_s19, 3 }
  0x13   : > { %s1115_s27 = scalar_select %p65_p4, %s1021_s17, %s67_s22  }
  0x14   : > { %s1288_s1 = sld [smem:[#allocation17_spill]]  ;;  %s203_s7 = scalar_lea.vmem [#allocation6], %s1119_s28 }
  0x15   : > { %s210_s8 = sshll.u32 %s203_s7, 4  ;;  %p1128_p6 = pnand %p751_p5, %p1105_p3  ;;  %s211_s8 = int_to_ptr.vmem [resolvable:$true] %s210_s8 }
  0x16   : > { %s1290_s2 = sld [smem:[#allocation18_spill]]  ;;  %s200_s22 = scalar_lea.sflag [#allocation7], %s199_s25 }
  0x17   : > { %s1035_s24 = smov 384   ;;  %s1036_s30 = smov 128  }
  0x18   : > { %s1037_s5 = smov 8   ;;  %s1140_s23 = sadd.s32 4294967295, %s1033_s20  }
  0x19   : > { %p80_p7 = scmp.ne.s32.totalorder %s1017_s16, %s1013_s15  ;;  %p81_p8 = scmp.eq.s32.totalorder %s1140_s23, 0 }
  0x1a   : > { %s207_s6 = scalar_lea.hbm %s1288_s1, %s685_s29  ;;  %p681_p9 = scmp.ge.s32.totalorder %s1033_s20, 1 }
  0x1b   : > { %s208_s9 = sshll.u32 %s207_s6, 4  ;;  %p169_p10 = scmp.lt.s32.totalorder %s1033_s20, 4  ;;  %s209_s9 = int_to_ptr.hbm [resolvable:$true] %s208_s9 }
  0x1c   : > { %s228_s13 = scalar_lea.hbm %s1290_s2, %s685_s29  ;;  %p1149_p11 = por %p81_p8, %p80_p7 }
  0x1d   : > { %s229_s14 = sshll.u32 %s228_s13, 4  ;;  %p1153_p12 = pnand %p681_p9, %p169_p10  ;;  %s230_s14 = int_to_ptr.hbm [resolvable:$true] %s229_s14 }
  0x1e   : > { %743 = dma.hbm_to_vmem [thread:$0]  (!%p1128_p6), %s209_s9, 2048, %s211_s8, %s200_s22, %s1035_s24, %s1036_s30, %s1037_s5  }
  0x1f   : > { %s1293_s0 = sld [smem:[#allocation16_spill]]  ;;  %p736_p13 = pneg %p1153_p12 }
  0x20   : > { %s1038_s8 = smov [#allocation3]   ;;  %s224_s11 = scalar_lea.vmem [#allocation8], %s1119_s28 }
  0x21   : > { %s185_s9 = sshll.u32 %s1038_s8, 4  ;;  %p737_p0 = pnand %p736_p13, %p81_p8  ;;  %s186_s9 = int_to_ptr.vmem [resolvable:$true] %s185_s9 }
  0x22   : > { %s231_s12 = sshll.u32 %s224_s11, 4  ;;  %s705_s13 = sshll.u32 %s1029_s19, 7  ;;  %s232_s12 = int_to_ptr.vmem [resolvable:$true] %s231_s12 }
  0x23   : > { %746 = dma.hbm_to_vmem [thread:$0]  (!%p1128_p6), %s230_s14, 2048, %s232_s12, %s200_s22, %s1035_s24, %s1036_s30, %s1037_s5  }
  0x24   : > { %s245_s6 = scalar_lea.vmem [#allocation9], %s1119_s28  ;;  %s1294_s11 = sand.u32 1, %s1021_s17  }
  0x25   : > { %s183_s15 = sshll.u32 %s1293_s0, 4  ;;  %s253_s7 = sshll.u32 %s245_s6, 4  ;;  %s184_s15 = int_to_ptr.hbm [resolvable:$true] %s183_s15  ;;  %s254_s7 = int_to_ptr.vmem [resolvable:$true] %s253_s7 }
  0x26   : > { %739 = dma.hbm_to_vmem [thread:$0]  (!%p737_p0), %s184_s15, 384, %s186_s9, [#allocation4], %s1036_s30, %s1036_s30, %s1037_s5  }
  0x27   : > { %s250_s0 = scalar_lea.hbm %s1281_s3, %s705_s13  ;;  %s242_s2 = scalar_lea.sflag [#allocation10], %s1294_s11 }
  0x28   : > { %s251_s1 = sshll.u32 %s250_s0, 4  ;;  %265 = sbr.rel (%p1153_p12) target bundleno = 419 (0x1a3), region = 36  ;;  %s252_s1 = int_to_ptr.hbm [resolvable:$true] %s251_s1 }
  0x29   : > { %749 = dma.hbm_to_vmem [thread:$0]  (!%p1128_p6), %s252_s1, 2048, %s254_s7, %s242_s2, %s1036_s30, %s1036_s30, %s1037_s5  }
  0x2d   : > { %996 = dma.done.wait (%p81_p8), [#allocation4], 384  }
  0x2e   : > { %998 = vsyncadd (%p81_p8), [#allocation4], 4294966912  ;;  %s272_s0 = sand.u32 1, %s1140_s23   ;;  %s274_s26 = sand.u32 1, %s1017_s16  }
  0x2f   : > { %s693_s28 = sshll.u32 %s274_s26, 7  ;;  %s273_s10 = scalar_lea.sflag [#allocation7], %s272_s0 }
  0x30   : > { %s1192_s14 = scalar_lea.vmem [#allocation6], %s693_s28 }
  0x31   : > { %1000 = dma.done.wait (%p1149_p11), %s273_s10, 4096  }
  0x32   : > { %1002 = vsyncadd (%p1149_p11), %s273_s10, 4294963200  ;;  %s1198_s1 = scalar_lea.vmem [#allocation8], %s693_s28  ;;  %s293_s2 = scalar_lea.sflag [#allocation10], %s274_s26 }
  0x33   : > { %s1200_s22 = scalar_lea.vmem [#allocation9], %s693_s28 }
  0x34   : > { %1004 = dma.done.wait (%p1149_p11), %s293_s2, 2048  }
  0x35   : > { %1006 = vsyncadd (%p1149_p11), %s293_s2, 4294965248  ;;  %p696_p1 = scmp.ne.s32.totalorder %s1025_s18, 0 }
  0x37   : > { %333 = sbr.rel (%p696_p1) target bundleno = 64 (0x40), region = 56 }
  0x3c   : > { %v1039_v0 = vmov 0.0  }
  0x3d   : > { %334 = vst [vmem:[#allocation2 + $0x10] sm:$0xff] %v1039_v0 }
  0x3e   : > { %335 = vst [vmem:[#allocation2] sm:$0xff] %v1039_v0 }
  0x3f   : > { %336 = vst [vmem:[#allocation2 + $0x8] sm:$0xff] %v1039_v0 }
  0x40 PF: > { %v355_v1 = vld [vmem:[%s1192_s14 + $0x78] sm:$0xff]  ;;  %v354_v2 = vld [vmem:[%s1192_s14 + $0x70] sm:$0xff]  ;;  %v353_v3 = vld [vmem:[%s1192_s14 + $0x68] sm:$0xff]  ;;  %p700_p2 = scmp.ne.s32.totalorder %s1025_s18, 2 }
  0x41   : > { %356 = vmatpush.msra.mxu0 %v355_v1  ;;  %706 = vmatpush.msra.mxu3 %v355_v1  ;;  %v352_v4 = vld [vmem:[%s1192_s14 + $0x60] sm:$0xff]  ;;  %v397_v5 = vld [vmem:[%s1198_s1 + $0x78] sm:$0xff]  ;;  %v396_v6 = vld [vmem:[%s1198_s1 + $0x70] sm:$0xff] }
  0x42   : > { %v351_v7 = vld [vmem:[%s1192_s14 + $0x58] sm:$0xff]  ;;  %398 = vmatpush.msra.mxu1 %v397_v5  ;;  %v395_v8 = vld [vmem:[%s1198_s1 + $0x68] sm:$0xff]  ;;  %v350_v9 = vld [vmem:[%s1192_s14 + $0x50] sm:$0xff] }
  0x43   : > { %357 = vmatpush.msra.mxu0 %v354_v2  ;;  %707 = vmatpush.msra.mxu3 %v354_v2  ;;  %v394_v10 = vld [vmem:[%s1198_s1 + $0x60] sm:$0xff]  ;;  %v349_v11 = vld [vmem:[%s1192_s14 + $0x48] sm:$0xff]  ;;  %v393_v12 = vld [vmem:[%s1198_s1 + $0x58] sm:$0xff] }
  0x44   : > { %399 = vmatpush.msra.mxu1 %v396_v6  ;;  %v348_v13 = vld [vmem:[%s1192_s14 + $0x40] sm:$0xff]  ;;  %v392_v14 = vld [vmem:[%s1198_s1 + $0x50] sm:$0xff]  ;;  %v347_v15 = vld [vmem:[%s1192_s14 + $0x38] sm:$0xff] }
  0x45   : > { %358 = vmatpush.msra.mxu0 %v353_v3  ;;  %708 = vmatpush.msra.mxu3 %v353_v3  ;;  %v391_v16 = vld [vmem:[%s1198_s1 + $0x48] sm:$0xff]  ;;  %v346_v17 = vld [vmem:[%s1192_s14 + $0x30] sm:$0xff]  ;;  %v390_v18 = vld [vmem:[%s1198_s1 + $0x40] sm:$0xff] }
  0x46   : > { %400 = vmatpush.msra.mxu1 %v395_v8  ;;  %v345_v19 = vld [vmem:[%s1192_s14 + $0x28] sm:$0xff]  ;;  %v389_v20 = vld [vmem:[%s1198_s1 + $0x38] sm:$0xff]  ;;  %v344_v21 = vld [vmem:[%s1192_s14 + $0x20] sm:$0xff] }
  0x47   : > { %359 = vmatpush.msra.mxu0 %v352_v4  ;;  %709 = vmatpush.msra.mxu3 %v352_v4  ;;  %v388_v22 = vld [vmem:[%s1198_s1 + $0x30] sm:$0xff]  ;;  %v343_v23 = vld [vmem:[%s1192_s14 + $0x18] sm:$0xff]  ;;  %v387_v24 = vld [vmem:[%s1198_s1 + $0x28] sm:$0xff] }
  0x48   : > { %401 = vmatpush.msra.mxu1 %v394_v10  ;;  %v342_v25 = vld [vmem:[%s1192_s14 + $0x10] sm:$0xff]  ;;  %v386_v26 = vld [vmem:[%s1198_s1 + $0x20] sm:$0xff]  ;;  %v341_v27 = vld [vmem:[%s1192_s14 + $0x8] sm:$0xff] }
  0x49   : > { %360 = vmatpush.msra.mxu0 %v351_v7  ;;  %710 = vmatpush.msra.mxu3 %v351_v7  ;;  %v385_v28 = vld [vmem:[%s1198_s1 + $0x18] sm:$0xff]  ;;  %v340_v29 = vld [vmem:[%s1192_s14] sm:$0xff]  ;;  %v337_v30 = vld [vmem:[#allocation3] sm:$0xff] }
  0x4a   : > { %402 = vmatpush.msra.mxu1 %v393_v12  ;;  %v338_v31 = vld [vmem:[#allocation3 + $0x8] sm:$0xff]  ;;  %v383_v33 = vld [vmem:[%s1198_s1 + $0x8] sm:$0xff]  ;;  %v382_v34 = vld [vmem:[%s1198_s1] sm:$0xff] }
  0x4b   : > { %361 = vmatpush.msra.mxu0 %v350_v9  ;;  %711 = vmatpush.msra.mxu3 %v350_v9  ;;  %v384_v32 = vld [vmem:[%s1198_s1 + $0x10] sm:$0xff]  ;;  %v339_v35 = vld [vmem:[#allocation3 + $0x10] sm:$0xff]  ;;  %v503_v38 = vld [vmem:[%s1200_s22 + $0x68] sm:$0xff] }
  0x4c   : > { %403 = vmatpush.msra.mxu1 %v392_v14  ;;  %v505_v36 = vld [vmem:[%s1200_s22 + $0x78] sm:$0xff]  ;;  %v504_v37 = vld [vmem:[%s1200_s22 + $0x70] sm:$0xff]  ;;  %v502_v39 = vld [vmem:[%s1200_s22 + $0x60] sm:$0xff] }
  0x4d   : > { %362 = vmatpush.msra.mxu0 %v349_v11  ;;  %712 = vmatpush.msra.mxu3 %v349_v11  ;;  %v501_v40 = vld [vmem:[%s1200_s22 + $0x58] sm:$0xff]  ;;  %v500_v41 = vld [vmem:[%s1200_s22 + $0x50] sm:$0xff]  ;;  %v499_v42 = vld [vmem:[%s1200_s22 + $0x48] sm:$0xff] }
  0x4e   : > { %404 = vmatpush.msra.mxu1 %v391_v16  ;;  %506 = vmatpush.msra.mxu2 %v505_v36  ;;  %v498_v43 = vld [vmem:[%s1200_s22 + $0x40] sm:$0xff]  ;;  %v497_v44 = vld [vmem:[%s1200_s22 + $0x38] sm:$0xff]  ;;  %v496_v45 = vld [vmem:[%s1200_s22 + $0x30] sm:$0xff] }
  0x4f   : > { %363 = vmatpush.msra.mxu0 %v348_v13  ;;  %713 = vmatpush.msra.mxu3 %v348_v13  ;;  %v495_v46 = vld [vmem:[%s1200_s22 + $0x28] sm:$0xff]  ;;  %v494_v47 = vld [vmem:[%s1200_s22 + $0x20] sm:$0xff]  ;;  %v493_v48 = vld [vmem:[%s1200_s22 + $0x18] sm:$0xff] }
  0x50   : > { %405 = vmatpush.msra.mxu1 %v390_v18  ;;  %507 = vmatpush.msra.mxu2 %v504_v37  ;;  %v492_v49 = vld [vmem:[%s1200_s22 + $0x10] sm:$0xff]  ;;  %v491_v50 = vld [vmem:[%s1200_s22 + $0x8] sm:$0xff]  ;;  %v490_v51 = vld [vmem:[%s1200_s22] sm:$0xff] }
  0x51   : > { %364 = vmatpush.msra.mxu0 %v347_v15  ;;  %714 = vmatpush.msra.mxu3 %v347_v15 }
  0x52   : > { %406 = vmatpush.msra.mxu1 %v389_v20  ;;  %508 = vmatpush.msra.mxu2 %v503_v38 }
  0x53   : > { %365 = vmatpush.msra.mxu0 %v346_v17  ;;  %715 = vmatpush.msra.mxu3 %v346_v17 }
  0x54   : > { %407 = vmatpush.msra.mxu1 %v388_v22  ;;  %509 = vmatpush.msra.mxu2 %v502_v39  ;;  %v487_v39 = vld [vmem:[#allocation2 + $0x10] sm:$0xff] }
  0x55   : > { %366 = vmatpush.msra.mxu0 %v345_v19  ;;  %716 = vmatpush.msra.mxu3 %v345_v19 }
  0x56   : > { %408 = vmatpush.msra.mxu1 %v387_v24  ;;  %510 = vmatpush.msra.mxu2 %v501_v40 }
  0x57   : > { %367 = vmatpush.msra.mxu0 %v344_v21  ;;  %717 = vmatpush.msra.mxu3 %v344_v21 }
  0x58   : > { %409 = vmatpush.msra.mxu1 %v386_v26  ;;  %511 = vmatpush.msra.mxu2 %v500_v41 }
  0x59   : > { %368 = vmatpush.msra.mxu0 %v343_v23  ;;  %718 = vmatpush.msra.mxu3 %v343_v23 }
  0x5a   : > { %410 = vmatpush.msra.mxu1 %v385_v28  ;;  %512 = vmatpush.msra.mxu2 %v499_v42  ;;  %v488_v42 = vld [vmem:[#allocation2] sm:$0xff] }
  0x5b   : > { %369 = vmatpush.msra.mxu0 %v342_v25  ;;  %719 = vmatpush.msra.mxu3 %v342_v25 }
  0x5c   : > { %411 = vmatpush.msra.mxu1 %v384_v32  ;;  %513 = vmatpush.msra.mxu2 %v498_v43 }
  0x5d   : > { %370 = vmatpush.msra.mxu0 %v341_v27  ;;  %720 = vmatpush.msra.mxu3 %v341_v27 }
  0x5e   : > { %412 = vmatpush.msra.mxu1 %v383_v33  ;;  %514 = vmatpush.msra.mxu2 %v497_v44 }
  0x5f   : > { %371 = vmatpush.msra.mxu0 %v340_v29  ;;  %721 = vmatpush.msra.mxu3 %v340_v29 }
  0x60   : > { %372 = vmatmul.f32.vlgmr.msra.gmra.mxu0 %v337_v30  ;;  %375 = vmatmul.f32.vlgmr.msra.gmra.mxu3 %v338_v31 }
  0x61   : > { %413 = vmatpush.msra.mxu1 %v382_v34  ;;  %515 = vmatpush.msra.mxu2 %v496_v45  ;;  %v489_v45 = vld [vmem:[#allocation2 + $0x8] sm:$0xff] }
  0x62   : > { %414 = vmatmul.f32.vlgmr.msra.gmra.mxu1 %v337_v30 }
  0x63   : > { %516 = vmatpush.msra.mxu2 %v495_v46 }
  0x65   : > { %517 = vmatpush.msra.mxu2 %v494_v47 }
  0x67   : > { %518 = vmatpush.msra.mxu2 %v493_v48 }
  0x68   : > { %378 = vmatmul.f32.gmra.mxu3 %v339_v35 }
  0x69   : > { %519 = vmatpush.msra.mxu2 %v492_v49 }
  0x6a   : > { %417 = vmatmul.f32.gmra.mxu1 %v338_v31 }
  0x6b   : > { %520 = vmatpush.msra.mxu2 %v491_v50 }
  0x6d   : > { %521 = vmatpush.msra.mxu2 %v490_v51 }
  0x72   : > { %420 = vmatmul.f32.gmra.mxu1 %v339_v35 }
  0xdd   : > { %v373_v52 = vpop.f32.mrf.mxu0 }
  0xde   : > { %v697_v53 = vmul.f32 -1.442695, %v373_v52 }
  0xdf   : > { %v415_v7 = vpop.f32.mrf.mxu1 }
  0xe0   : > { %811 = vpow2.f32 %v697_v53 }
  0xe3   : > { %v376_v54 = vpop.f32.mrf.mxu3 }
  0xe4   : > { %v698_v55 = vmul.f32 -1.442695, %v376_v54 }
  0xe6   : > { %v812_v56 = vpop.eup %811  ;;  %813 = vpow2.f32 %v698_v55 }
  0xe7   : > { %v433_v57 = vadd.f32 1.0, %v812_v56  ;;  %v418_v25 = vpop.f32.mrf.mxu1 }
  0xe9   : > { %815 = vrcp.f32 %v433_v57  ;;  %v447_v1 = vand.u32 2147483648, %v433_v57  ;;  %v445_v4 = vand.u32 2147483647, %v433_v57  ;;  %vm441_vm1 = vweird.f32 %v433_v57 }
  0xeb   : > { %v379_v58 = vpop.f32.mrf.mxu3  ;;  %v448_v10 = vor.u32 1.1754944e-38, %v447_v1  ;;  %vm446_vm3 = vcmp.eq.f32.partialorder %v445_v4, 8.507059e+37 }
  0xec   : > { %v814_v59 = vpop.eup %813  ;;  %v699_v60 = vmul.f32 -1.442695, %v379_v58 }
  0xed   : > { %v434_v61 = vadd.f32 1.0, %v814_v59 }
  0xee   : > { %817 = vpow2.f32 %v699_v60 }
  0xef   : > { %v816_v62 = vpop.eup %815  ;;  %819 = vrcp.f32 %v434_v61  ;;  %v462_v14 = vand.u32 2147483648, %v434_v61  ;;  %v460_v17 = vand.u32 2147483647, %v434_v61  ;;  %vm456_vm5 = vweird.f32 %v434_v61  ;;  %v421_v37 = vpop.f32.mrf.mxu1 }
  0xf0   : > { %v437_v63 = vmul.f32 %v816_v62, %v433_v57  ;;  %vm442_vm0 = vweird.f32 %v816_v62 }
  0xf1   : > { %vm443_vm2 = vmor %vm441_vm1, %vm442_vm0  ;;  %v463_v21 = vor.u32 1.1754944e-38, %v462_v14  ;;  %vm461_vm7 = vcmp.eq.f32.partialorder %v460_v17, 8.507059e+37 }
  0xf2   : > { %v438_v0 = vsub.f32 1.0, %v437_v63 }
  0xf4   : > { %v818_v2 = vpop.eup %817  ;;  %v439_v3 = vmul.f32 %v816_v62, %v438_v0 }
  0xf5   : > { %v820_v5 = vpop.eup %819  ;;  %v435_v6 = vadd.f32 1.0, %v818_v2 }
  0xf6   : > { %v440_v8 = vadd.f32 %v816_v62, %v439_v3  ;;  %v452_v9 = vmul.f32 %v820_v5, %v434_v61  ;;  %vm457_vm4 = vweird.f32 %v820_v5 }
  0xf7   : > { %821 = vrcp.f32 %v435_v6  ;;  %vm458_vm6 = vmor %vm456_vm5, %vm457_vm4  ;;  %v477_v28 = vand.u32 2147483648, %v435_v6  ;;  %v475_v30 = vand.u32 2147483647, %v435_v6  ;;  %vm471_vm9 = vweird.f32 %v435_v6 }
  0xf8   : > { %v444_v11 = vsel %vm443_vm2, %v816_v62, %v440_v8  ;;  %v453_v12 = vsub.f32 1.0, %v452_v9 }
  0xf9   : > { %v449_v13 = vsel %vm446_vm3, %v448_v10, %v444_v11  ;;  %v478_v33 = vor.u32 1.1754944e-38, %v477_v28  ;;  %vm476_vm11 = vcmp.eq.f32.partialorder %v475_v30, 8.507059e+37 }
  0xfa   : > { %v481_v15 = vmul.f32 %v449_v13, %v373_v52  ;;  %v454_v16 = vmul.f32 %v820_v5, %v453_v12 }
  0xfc   : > { %v455_v18 = vadd.f32 %v820_v5, %v454_v16  ;;  %v484_v19 = vmul.f32 %v481_v15, %v415_v7 }
  0xfd   : > { %v822_v20 = vpop.eup %821 }
  0xfe   : > { %v459_v22 = vsel %vm458_vm6, %v820_v5, %v455_v18  ;;  %v467_v23 = vmul.f32 %v822_v20, %v435_v6  ;;  %522 = vmatmul.f32.vlgmr.msra.gmra.mxu2 %v484_v19  ;;  %vm472_vm8 = vweird.f32 %v822_v20 }
  0xff   : > { %v464_v24 = vsel %vm461_vm7, %v463_v21, %v459_v22  ;;  %vm473_vm10 = vmor %vm471_vm9, %vm472_vm8 }
 0x100   : > { %v482_v26 = vmul.f32 %v464_v24, %v376_v54  ;;  %v468_v27 = vsub.f32 1.0, %v467_v23 }
 0x102   : > { %v469_v29 = vmul.f32 %v822_v20, %v468_v27  ;;  %v485_v32 = vmul.f32 %v482_v26, %v418_v25 }
 0x104   : > { %v470_v31 = vadd.f32 %v822_v20, %v469_v29 }
 0x106   : > { %v474_v34 = vsel %vm473_vm10, %v822_v20, %v470_v31  ;;  %525 = vmatmul.f32.gmra.mxu2 %v485_v32 }
 0x107   : > { %v479_v35 = vsel %vm476_vm11, %v478_v33, %v474_v34 }
 0x108   : > { %v483_v36 = vmul.f32 %v479_v35, %v379_v58 }
 0x10a   : > { %v486_v38 = vmul.f32 %v483_v36, %v421_v37 }
 0x10e   : > { %528 = vmatmul.f32.gmra.mxu2 %v486_v38 }
 0x181   : > { %v523_v40 = vpop.f32.mrf.mxu2 }
 0x182   : > { %v532_v41 = vadd.f32 %v523_v40, %v487_v39 }
 0x184   : > { %535 = vst [vmem:[#allocation2 + $0x10] sm:$0xff] %v532_v41 }
 0x189   : > { %v526_v43 = vpop.f32.mrf.mxu2 }
 0x18a   : > { %v533_v44 = vadd.f32 %v526_v43, %v488_v42 }
 0x18c   : > { %536 = vst [vmem:[#allocation2] sm:$0xff] %v533_v44 }
 0x190   : > { %541 = sbr.rel (%p700_p2) target bundleno = 413 (0x19d), region = 60 }
 0x191   : > { %v529_v46 = vpop.f32.mrf.mxu2 }
 0x192   : > { %v534_v47 = vadd.f32 %v529_v46, %v489_v45 }
 0x194   : > { %537 = vst [vmem:[#allocation2 + $0x8] sm:$0xff] %v534_v47 }
 0x195   : > { %v542_v48 = vld [vmem:[#allocation2 + $0x10] sm:$0xff]  ;;  %v543_v49 = vld [vmem:[#allocation2] sm:$0xff] }
 0x196   : > { %545 = vst [vmem:[#allocation11] sm:$0xff] %v542_v48 }
 0x197   : > { %546 = vst [vmem:[#allocation11 + $0x8] sm:$0xff] %v543_v49 }
 0x19b   : > { %v544_v50 = vld [vmem:[#allocation2 + $0x8] sm:$0xff] }
 0x19c   : > { %547 = vst [vmem:[#allocation11 + $0x10] sm:$0xff] %v544_v50 }
 0x19d PF: > { %p753_p3 = scmp.eq.s32.totalorder %s1140_s23, 2  ;;  %s558_s5 = sshll.u32 %s1282_s4, 4  ;;  %s559_s5 = int_to_ptr.hbm [resolvable:$true] %s558_s5 }
 0x19e   : > { %s1040_s25 = smov [#allocation11]   ;;  %s1041_s15 = smov 128  }
 0x19f   : > { %s556_s29 = sshll.u32 %s1040_s25, 4  ;;  %s1042_s18 = smov 8   ;;  %s557_s29 = int_to_ptr.vmem [resolvable:$true] %s556_s29 }
 0x1a0   : > { %733 = dma.vmem_to_hbm [thread:$0]  (%p753_p3), %s557_s29, 384, %s559_s5, [#allocation5], %s1041_s15, %s1041_s15, %s1042_s18  }
 0x1a1   : > { %1008 = dma.done.wait (%p753_p3), [#allocation5], 384  }
 0x1a2   : > { %1010 = vsyncadd (%p753_p3), [#allocation5], 4294966912 }
 0x1a3 PF: > { %s22_s20 = sadd.s32 1, %s1033_s20   ;;  %s1295_s15 = smov %s1017_s16 }
 0x1a4   : > { %p19_p4 = scmp.ge.s32.totalorder %s22_s20, 5   ;;  %s1296_s16 = smov %s1021_s17 }
 0x1a5   : > { %s1297_s17 = smov %s1115_s27  ;;  %s1298_s18 = smov %s1029_s19 }
 0x1a6   : > { %s1299_s19 = smov %s1301_s21  ;;  %21 = sbr.rel (!%p19_p4) target bundleno = 12 (0xc), region = 112 }
 0x1ab   :  { %575 = vsyncpa [#allocation4], 1 }
 0x1ac   :  { %577 = vsyncpa [#allocation4 + $0x1], 1 }
 0x1ad   :  { %578 = vsyncpa [#allocation7], 1 }
 0x1ae   :  { %580 = vsyncpa [#allocation7 + $0x1], 1 }
 0x1af   :  { %581 = vsyncpa [#allocation10], 1 }
 0x1b0   :  { %583 = vsyncpa [#allocation10 + $0x1], 1 }
 0x1b1   :  { %584 = vsyncpa [#allocation5], 1 }
 0x1b2   :  { %586 = vsyncpa [#allocation5 + $0x1], 1 }

</bundles_post_ra>
